<compile_context>
chip_gen: v6e
topology: v6e:2x2x1
jax: 0.10.0
libtpu: 0.0.40
codegen_flags: <defaults>
</compile_context>

<pallas_src>
import functools

import jax
import jax.numpy as jnp
import numpy as np
from jax.experimental import pallas as pl
from jax.experimental.pallas import tpu as pltpu


# ----------------------------- init-time helpers (host) -----------------------------

def sym_norm_adj(W: np.ndarray) -> np.ndarray:
    """numpy port of the PyTorch sym_norm_Adj."""
    assert W.shape[0] == W.shape[1]
    N = W.shape[0]
    W = W + 0.5 * np.identity(N)
    D = np.diag(1.0 / np.sum(W, axis=1))
    M = np.dot(np.sqrt(D), W)
    M = np.dot(M, np.sqrt(D))
    return M.astype(np.float32)


def _softmax_lastdim(x):
    m = jnp.max(x, axis=-1, keepdims=True)
    e = jnp.exp(x - m)
    return e / jnp.sum(e, axis=-1, keepdims=True)


def embgcn_prepare(adj_softmaxed, wpool, bpool, w_lin, b_lin):
    """__init__-time constant prep (host).  Everything here depends only on module
    parameters, so it is hoisted out of the per-call kernel:
      * colsum: einsum('nm,bmc->bmc', softmax(adj), x) degenerates to a per-node
        column-sum scale of x; the column sum of the (constant) adjacency is
        precomputed here so the (N,N) adjacency never enters the kernel.
      * wpool_flat: weight pool and bias pool fused into a single MXU RHS.
      * lin: Linear weight and bias packed into one small buffer.
    """
    De, I, O = wpool.shape
    N = adj_softmaxed.shape[0]
    colsum = jnp.sum(_softmax_lastdim(adj_softmaxed), axis=0).reshape(N, 1)   # (N, 1)
    wpool_flat = jnp.concatenate([wpool.reshape(De, I * O), bpool], axis=1)   # (De, I*O+O)
    lin = jnp.concatenate([w_lin, b_lin.reshape(1, O)], axis=0)               # (I+1, O)
    return colsum, wpool_flat, lin


# ----------------------------------- Pallas kernel -----------------------------------

def _embgcn_kernel(emb_ref, x_exp_ref, x_st_ref, wpool_ref, lin_ref, colsum_ref,
                   out_ref, *, B, N, I, O):
    f32 = jnp.float32
    bf16 = jnp.bfloat16

    e_bf = emb_ref[...].astype(bf16)                                   # (N, De)

    # s = softmax(relu(E @ E^T)); contract the LAST dims of both operands so the
    # transposed operand is consumed natively by the MXU (no vxpose of E).
    logits = jax.lax.dot_general(e_bf, e_bf, (((1,), (1,)), ((), ())),
                                 preferred_element_type=f32)           # (N, N)
    s = _softmax_lastdim(jnp.maximum(logits, 0.0))

    # Fused adaptive weights + bias: ONE matmul E @ [wpool_flat | bpool] -> (N, I*O+O).
    wb = jnp.dot(e_bf, wpool_ref[...].astype(bf16),
                 preferred_element_type=f32)
    w_flat = wb[:, :I * O]                                             # (N, I*O)
    bias = wb[:, I * O:]                                               # (N, O)

    # Graph-conv branch: ONE matmul for all batches & channels.  x_exp has lane
    # layout (b, i, o) so the per-(n, i) weights multiply without any broadcasts.
    # The identity in `supports = eye + s` is folded in as "+ x_exp" (no eye built).
    x_exp = x_exp_ref[...]                                             # (N, B*I*O) f32
    xg = jnp.dot(s.astype(bf16), x_exp.astype(bf16),
                 preferred_element_type=f32) + x_exp                   # (N, B*I*O)

    # Static branch: ONE matmul for all batches.  colsum_ref is the precomputed
    # column sum of softmax(sym_norm_adj), tiled to the (B*N, 1) row layout.
    lin = lin_ref[...]                                                 # (I+1, O)
    xs = jnp.dot((x_st_ref[...] * colsum_ref[...]).astype(bf16),
                 lin[:I, :].astype(bf16),
                 preferred_element_type=f32) + lin[I:, :]              # (B*N, O)
    gate = jax.nn.sigmoid(xs) * xs                                     # (B*N, O)

    # Cheap per-batch VPU tail (B, I tiny & static): whole-vreg multiply against the
    # fused weights, then reduce the I lane-groups with plain O-wide adds.
    for b in range(B):
        pb = xg[:, b * I * O:(b + 1) * I * O] * w_flat                 # (N, I*O)
        acc = bias
        for i in range(I):
            acc = acc + pb[:, i * O:(i + 1) * O]                       # (N, O)
        out_ref[b] = (acc + gate[b * N:(b + 1) * N, :]).astype(out_ref.dtype)


def embgcn_forward(x, node_emb, colsum, wpool_flat, lin):
    """x: (B, N, I); node_emb: (N, De); colsum: (N, 1); wpool_flat: (De, I*O+O);
       lin: (I+1, O)."""
    B, N, I = x.shape
    O = lin.shape[1]

    # Layout plumbing only (no arithmetic hoisted): lane-expand x to the (b, i, o)
    # layout so supports@x is a single lane-dense MXU call for all batches/channels,
    # and flatten x to (B*N, I) rows for the batched Linear.
    x_exp = jnp.broadcast_to(jnp.transpose(x, (1, 0, 2))[:, :, :, None],
                             (N, B, I, O)).reshape(N, B * I * O)
    x_st = x.reshape(B * N, I)
    colsum_bn = jnp.tile(colsum, (B, 1))                               # (B*N, 1)

    vmem = pl.BlockSpec(memory_space=pltpu.MemorySpace.VMEM)
    kernel = functools.partial(_embgcn_kernel, B=B, N=N, I=I, O=O)
    return pl.pallas_call(
        kernel,
        out_shape=jax.ShapeDtypeStruct((B, N, O), jnp.float32),
        in_specs=[vmem] * 6,
        out_specs=vmem,
        # Single invocation: all operands are tiny and fully VMEM-resident.
        # If N ever scales up: add a grid over N-row tiles of `s`/`xg` with
        # dimension_semantics=("parallel",) so v7x's two TensorCores split the work,
        # and mind v7x's 64 MiB VMEM ceiling (128 MiB on v5e/v6e).
    )(node_emb, x_exp, x_st, wpool_flat, lin, colsum_bn)


# ------------------------------- pure-JAX references -------------------------------

def embgcn_reference(x, node_emb, adj_softmaxed, wpool, bpool, w_lin, b_lin):
    """Full-f32 reference, faithful to the PyTorch module."""
    N = node_emb.shape[0]
    hi = jax.lax.Precision.HIGHEST
    supports = _softmax_lastdim(jnp.maximum(node_emb @ node_emb.T, 0.0)) \
        + jnp.eye(N, dtype=jnp.float32)
    A2 = _softmax_lastdim(adj_softmaxed)
    x_static = jnp.einsum('nm,bmc->bmc', A2, x, precision=hi)
    x_static = jnp.einsum('bni,io->bno', x_static, w_lin, precision=hi) + b_lin
    weights = jnp.einsum('nd,dio->nio', node_emb, wpool, precision=hi)
    bias = jnp.einsum('nd,do->no', node_emb, bpool, precision=hi)
    x_g = jnp.einsum('nm,bmc->bnc', supports, x, precision=hi)
    x_gconv = jnp.einsum('bni,nio->bno', x_g, weights, precision=hi) + bias
    return x_gconv + jax.nn.sigmoid(x_static) * x_static


def embgcn_reference_mixed(x, node_emb, adj_softmaxed, wpool, bpool, w_lin, b_lin):
    """Reference with the SAME mixed-precision recipe as the kernel:
    bf16 matmul operands, f32 accumulation, f32 everywhere else."""
    f32, bf16 = jnp.float32, jnp.bfloat16
    B, N, I = x.shape
    De, O = bpool.shape
    e_bf = node_emb.astype(bf16)
    logits = jax.lax.dot_general(e_bf, e_bf, (((1,), (1,)), ((), ())),
                                 preferred_element_type=f32)
    s = _softmax_lastdim(jnp.maximum(logits, 0.0))
    xg = jnp.einsum('nm,bmi->bni', s.astype(bf16), x.astype(bf16),
                    preferred_element_type=f32) + x
    wb = jnp.dot(e_bf,
                 jnp.concatenate([wpool.reshape(De, I * O), bpool], 1).astype(bf16),
                 preferred_element_type=f32)
    W3 = wb[:, :I * O].reshape(N, I, O)
    bias = wb[:, I * O:]
    gconv = jnp.sum(xg[:, :, :, None] * W3[None, :, :, :], axis=2) + bias
    colsum = jnp.sum(_softmax_lastdim(adj_softmaxed), axis=0).reshape(1, N, 1)
    xs = jnp.einsum('bni,io->bno', (colsum * x).astype(bf16), w_lin.astype(bf16),
                    preferred_element_type=f32) + b_lin
    return gconv + jax.nn.sigmoid(xs) * xs


# ---------------------------------------- main ----------------------------------------

if __name__ == "__main__":
    B, N, dim_in, dim_out, embed_dim = 2, 8, 4, 16, 8
    cheb_k = 2  # unused in the forward pass, kept for parity with the module signature

    key = jax.random.PRNGKey(0)
    k_adj, k_x, k_emb, k_wp, k_bp, k_wl, k_bl = jax.random.split(key, 7)

    # module "__init__": adjacency -> sym_norm_Adj -> F.softmax (dim=1 for 2-D)
    adj_np = np.asarray(jax.random.uniform(k_adj, (N, N), dtype=jnp.float32))
    adj_np = (adj_np + adj_np.T) * 0.5
    adj_sm = _softmax_lastdim(jnp.asarray(sym_norm_adj(adj_np)))       # (N, N), float32

    # deterministic synthetic parameters (shapes from __init__)
    wpool = 0.1 * jax.random.normal(k_wp, (embed_dim, dim_in, dim_out), dtype=jnp.float32)
    bpool = 0.1 * jax.random.normal(k_bp, (embed_dim, dim_out), dtype=jnp.float32)
    w_lin = 0.1 * jax.random.normal(k_wl, (dim_in, dim_out), dtype=jnp.float32)  # Linear W^T
    b_lin = 0.1 * jax.random.normal(k_bl, (dim_out,), dtype=jnp.float32)

    # forward inputs
    x = jax.random.normal(k_x, (B, N, dim_in), dtype=jnp.float32)
    node_emb = jax.random.normal(k_emb, (N, embed_dim), dtype=jnp.float32)

    # init-time constant prep (colsum of softmax(adj), fused weight/bias pools, packed Linear)
    colsum, wpool_flat, lin = embgcn_prepare(adj_sm, wpool, bpool, w_lin, b_lin)

    out = jax.block_until_ready(embgcn_forward(x, node_emb, colsum, wpool_flat, lin))

    ref_mixed = jax.block_until_ready(
        embgcn_reference_mixed(x, node_emb, adj_sm, wpool, bpool, w_lin, b_lin))
    ref_f32 = jax.block_until_ready(
        embgcn_reference(x, node_emb, adj_sm, wpool, bpool, w_lin, b_lin))

    # Rigorous check vs the identically mixed-precision reference, plus a loose
    # sanity check vs the full-f32 module math (bounds bf16-operand drift).
    np.testing.assert_allclose(np.asarray(out), np.asarray(ref_mixed), rtol=2e-3, atol=2e-3)
    np.testing.assert_allclose(np.asarray(out), np.asarray(ref_f32), rtol=1e-1, atol=1e-1)
    print("KERNEL_OK")
</pallas_src>

<mosaic_0001>
module attributes {stable_mosaic.version = 11 : i64} {
  func.func @_embgcn_kernel(%arg0: memref<8x8xf32, #tpu.memory_space<vmem>>, %arg1: memref<8x128xf32, #tpu.memory_space<vmem>>, %arg2: memref<16x4xf32, #tpu.memory_space<vmem>>, %arg3: memref<8x80xf32, #tpu.memory_space<vmem>>, %arg4: memref<5x16xf32, #tpu.memory_space<vmem>>, %arg5: memref<16x1xf32, #tpu.memory_space<vmem>>, %arg6: memref<2x8x16xf32, #tpu.memory_space<vmem>>) attributes {dimension_semantics = [], scalar_prefetch = 0 : i64, scratch_operands = 0 : i64, tpu.core_type = #tpu.core_type<tc>} {
    %c0 = arith.constant 0 : index
    %c0_0 = arith.constant 0 : index
    %0 = vector.load %arg0[%c0, %c0_0] : memref<8x8xf32, #tpu.memory_space<vmem>>, vector<8x8xf32>
    %1 = arith.truncf %0 : vector<8x8xf32> to vector<8x8xbf16>
    %cst = arith.constant dense<0.000000e+00> : vector<8x8xf32>
    %2 = tpu.matmul %1, %1, %cst {dimension_numbers = #tpu.dot_dimension_numbers<[1], [1], [0], [0], [0, 0, 1, 0], [], []>} : vector<8x8xbf16>, vector<8x8xbf16>, vector<8x8xf32> -> vector<8x8xf32>
    %cst_1 = arith.constant 0.000000e+00 : f32
    %3 = vector.broadcast %cst_1 : f32 to vector<8x8xf32>
    %4 = arith.maximumf %2, %3 : vector<8x8xf32>
    %cst_2 = arith.constant dense<0xFF800000> : vector<8xf32>
    %5 = vector.multi_reduction <maximumf>, %4, %cst_2 [1] : vector<8x8xf32> to vector<8xf32>
    %6 = vector.shape_cast %5 : vector<8xf32> to vector<8x1xf32>
    %7 = vector.broadcast %6 : vector<8x1xf32> to vector<8x8xf32>
    %8 = arith.subf %4, %7 : vector<8x8xf32>
    %9 = math.exp %8 : vector<8x8xf32>
    %cst_3 = arith.constant dense<0.000000e+00> : vector<8xf32>
    %10 = vector.multi_reduction <add>, %9, %cst_3 [1] : vector<8x8xf32> to vector<8xf32>
    %11 = vector.shape_cast %10 : vector<8xf32> to vector<8x1xf32>
    %12 = vector.broadcast %11 : vector<8x1xf32> to vector<8x8xf32>
    %13 = arith.divf %9, %12 : vector<8x8xf32>
    %c0_4 = arith.constant 0 : index
    %c0_5 = arith.constant 0 : index
    %14 = vector.load %arg3[%c0_4, %c0_5] : memref<8x80xf32, #tpu.memory_space<vmem>>, vector<8x80xf32>
    %15 = arith.truncf %14 : vector<8x80xf32> to vector<8x80xbf16>
    %cst_6 = arith.constant dense<0.000000e+00> : vector<8x80xf32>
    %16 = tpu.matmul %1, %15, %cst_6 {dimension_numbers = #tpu.dot_dimension_numbers<[1], [0], [0], [1], [0, 0, 1, 1], [], []>} : vector<8x8xbf16>, vector<8x80xbf16>, vector<8x80xf32> -> vector<8x80xf32>
    %17 = vector.extract_strided_slice %16 {offsets = [0, 0], sizes = [8, 64], strides = [1, 1]} : vector<8x80xf32> to vector<8x64xf32>
    %18 = vector.extract_strided_slice %16 {offsets = [0, 64], sizes = [8, 16], strides = [1, 1]} : vector<8x80xf32> to vector<8x16xf32>
    %c0_7 = arith.constant 0 : index
    %c0_8 = arith.constant 0 : index
    %19 = vector.load %arg1[%c0_7, %c0_8] : memref<8x128xf32, #tpu.memory_space<vmem>>, vector<8x128xf32>
    %20 = arith.truncf %13 : vector<8x8xf32> to vector<8x8xbf16>
    %21 = arith.truncf %19 : vector<8x128xf32> to vector<8x128xbf16>
    %cst_9 = arith.constant dense<0.000000e+00> : vector<8x128xf32>
    %22 = tpu.matmul %20, %21, %cst_9 {dimension_numbers = #tpu.dot_dimension_numbers<[1], [0], [0], [1], [0, 0, 1, 1], [], []>} : vector<8x8xbf16>, vector<8x128xbf16>, vector<8x128xf32> -> vector<8x128xf32>
    %23 = arith.addf %22, %19 : vector<8x128xf32>
    %c0_10 = arith.constant 0 : index
    %c0_11 = arith.constant 0 : index
    %24 = vector.load %arg4[%c0_10, %c0_11] : memref<5x16xf32, #tpu.memory_space<vmem>>, vector<5x16xf32>
    %c0_12 = arith.constant 0 : index
    %c0_13 = arith.constant 0 : index
    %25 = vector.load %arg2[%c0_12, %c0_13] : memref<16x4xf32, #tpu.memory_space<vmem>>, vector<16x4xf32>
    %c0_14 = arith.constant 0 : index
    %c0_15 = arith.constant 0 : index
    %26 = vector.load %arg5[%c0_14, %c0_15] : memref<16x1xf32, #tpu.memory_space<vmem>>, vector<16x1xf32>
    %27 = vector.broadcast %26 : vector<16x1xf32> to vector<16x4xf32>
    %28 = arith.mulf %25, %27 : vector<16x4xf32>
    %29 = arith.truncf %28 : vector<16x4xf32> to vector<16x4xbf16>
    %30 = vector.extract_strided_slice %24 {offsets = [0, 0], sizes = [4, 16], strides = [1, 1]} : vector<5x16xf32> to vector<4x16xf32>
    %31 = arith.truncf %30 : vector<4x16xf32> to vector<4x16xbf16>
    %cst_16 = arith.constant dense<0.000000e+00> : vector<16x16xf32>
    %32 = tpu.matmul %29, %31, %cst_16 {dimension_numbers = #tpu.dot_dimension_numbers<[1], [0], [0], [1], [0, 0, 1, 1], [], []>} : vector<16x4xbf16>, vector<4x16xbf16>, vector<16x16xf32> -> vector<16x16xf32>
    %33 = vector.extract_strided_slice %24 {offsets = [4, 0], sizes = [1, 16], strides = [1, 1]} : vector<5x16xf32> to vector<1x16xf32>
    %34 = vector.broadcast %33 : vector<1x16xf32> to vector<16x16xf32>
    %35 = arith.addf %32, %34 : vector<16x16xf32>
    %36 = arith.negf %35 : vector<16x16xf32>
    %37 = math.exp %36 : vector<16x16xf32>
    %cst_17 = arith.constant 1.000000e+00 : f32
    %38 = vector.broadcast %cst_17 : f32 to vector<16x16xf32>
    %39 = arith.addf %38, %37 : vector<16x16xf32>
    %40 = arith.divf %38, %39 : vector<16x16xf32>
    %41 = arith.mulf %40, %35 : vector<16x16xf32>
    %42 = vector.extract_strided_slice %23 {offsets = [0, 0], sizes = [8, 64], strides = [1, 1]} : vector<8x128xf32> to vector<8x64xf32>
    %43 = arith.mulf %42, %17 : vector<8x64xf32>
    %44 = vector.extract_strided_slice %43 {offsets = [0, 0], sizes = [8, 16], strides = [1, 1]} : vector<8x64xf32> to vector<8x16xf32>
    %45 = arith.addf %18, %44 : vector<8x16xf32>
    %46 = vector.extract_strided_slice %43 {offsets = [0, 16], sizes = [8, 16], strides = [1, 1]} : vector<8x64xf32> to vector<8x16xf32>
    %47 = arith.addf %45, %46 : vector<8x16xf32>
    %48 = vector.extract_strided_slice %43 {offsets = [0, 32], sizes = [8, 16], strides = [1, 1]} : vector<8x64xf32> to vector<8x16xf32>
    %49 = arith.addf %47, %48 : vector<8x16xf32>
    %50 = vector.extract_strided_slice %43 {offsets = [0, 48], sizes = [8, 16], strides = [1, 1]} : vector<8x64xf32> to vector<8x16xf32>
    %51 = arith.addf %49, %50 : vector<8x16xf32>
    %52 = vector.extract_strided_slice %41 {offsets = [0, 0], sizes = [8, 16], strides = [1, 1]} : vector<16x16xf32> to vector<8x16xf32>
    %53 = arith.addf %51, %52 : vector<8x16xf32>
    %c0_18 = arith.constant 0 : index
    %c0_19 = arith.constant 0 : index
    %c0_20 = arith.constant 0 : index
    %54 = vector.load %arg6[%c0_18, %c0_19, %c0_20] : memref<2x8x16xf32, #tpu.memory_space<vmem>>, vector<1x8x16xf32>
    %55 = vector.shape_cast %54 : vector<1x8x16xf32> to vector<8x16xf32>
    %56 = vector.shape_cast %53 : vector<8x16xf32> to vector<1x8x16xf32>
    tpu.vector_store %arg6[%c0_18, %c0_19, %c0_20], %56 {strides = array<i32>} : memref<2x8x16xf32, #tpu.memory_space<vmem>>, vector<1x8x16xf32>,
    %57 = vector.extract_strided_slice %23 {offsets = [0, 64], sizes = [8, 64], strides = [1, 1]} : vector<8x128xf32> to vector<8x64xf32>
    %58 = arith.mulf %57, %17 : vector<8x64xf32>
    %59 = vector.extract_strided_slice %58 {offsets = [0, 0], sizes = [8, 16], strides = [1, 1]} : vector<8x64xf32> to vector<8x16xf32>
    %60 = arith.addf %18, %59 : vector<8x16xf32>
    %61 = vector.extract_strided_slice %58 {offsets = [0, 16], sizes = [8, 16], strides = [1, 1]} : vector<8x64xf32> to vector<8x16xf32>
    %62 = arith.addf %60, %61 : vector<8x16xf32>
    %63 = vector.extract_strided_slice %58 {offsets = [0, 32], sizes = [8, 16], strides = [1, 1]} : vector<8x64xf32> to vector<8x16xf32>
    %64 = arith.addf %62, %63 : vector<8x16xf32>
    %65 = vector.extract_strided_slice %58 {offsets = [0, 48], sizes = [8, 16], strides = [1, 1]} : vector<8x64xf32> to vector<8x16xf32>
    %66 = arith.addf %64, %65 : vector<8x16xf32>
    %67 = vector.extract_strided_slice %41 {offsets = [8, 0], sizes = [8, 16], strides = [1, 1]} : vector<16x16xf32> to vector<8x16xf32>
    %68 = arith.addf %66, %67 : vector<8x16xf32>
    %c1 = arith.constant 1 : index
    %c0_21 = arith.constant 0 : index
    %c0_22 = arith.constant 0 : index
    %69 = vector.load %arg6[%c1, %c0_21, %c0_22] : memref<2x8x16xf32, #tpu.memory_space<vmem>>, vector<1x8x16xf32>
    %70 = vector.shape_cast %69 : vector<1x8x16xf32> to vector<8x16xf32>
    %71 = vector.shape_cast %68 : vector<8x16xf32> to vector<1x8x16xf32>
    tpu.vector_store %arg6[%c1, %c0_21, %c0_22], %71 {strides = array<i32>} : memref<2x8x16xf32, #tpu.memory_space<vmem>>, vector<1x8x16xf32>,
    return
  }
}

</mosaic_0001>

<bundles_post_ra>
// kernel: tpu_custom_call.1
= control target key start
LH: loop header
LB: loop body
LE: loop exit
PB: predicated region body
PF: predicated region fallthrough
CT: control target
= control target key end

     0   :  { %vm27_vm0 = vcmask 64512   ;;  %s523_s0 = inlined_call_operand.vmem [shape: f32[8,8], index: 0, kind: input, shape index: {}]   ;;  %s524_s1 = inlined_call_operand.vmem [shape: f32[8,128], index: 1, kind: input, shape index: {}]   ;;  %s525_s2 = inlined_call_operand.vmem [shape: f32[16,4], index: 2, kind: input, shape index: {}]   ;;  %s526_s3 = inlined_call_operand.vmem [shape: f32[8,80], index: 3, kind: input, shape index: {}]   ;;  %s527_s4 = inlined_call_operand.vmem [shape: f32[5,16], index: 4, kind: input, shape index: {}]   ;;  %s528_s5 = inlined_call_operand.vmem [shape: f32[16,1], index: 5, kind: input, shape index: {}]   ;;  %s529_s6 = inlined_call_operand.hbm [shape: f32[2,8,16], index: 6, kind: output, shape index: {}]  }
   0x1   :  { %v25_v0 = vld [vmem:[%s523_s0] sm:$0xff] }
   0x2   :  { %11 = vsyncpa [#allocation3], 0  ;;  %v426_v1 = vmov 0.0   ;;  %v26_v2 = vpack.c.bf16 %v25_v0, %v25_v0  ;;  %vm427_vm1 = vmmov 0   ;;  %v182_v4 = vld [vmem:[%s528_s5 + $0x8] sm:$0xff]  ;;  %v428_v5 = vmov 0  }
   0x3   :  { %353 = vmatprep.subr.bf16.mxu0 %v426_v1  ;;  %355 = vmatprep.mubr.msk.bf16.mxu0 %vm427_vm1, %v426_v1  ;;  %v181_v12 = vld [vmem:[%s528_s5] sm:$0xff]  ;;  %vm85_vm2 = vcmask 1043456   ;;  %vm205_vm3 = vcmask 1041408   ;;  %v180_v26 = vld [vmem:[%s525_s2 + $0x8] sm:$0xff]  ;;  %vm201_vm4 = vcmask 31744   ;;  %s429_s8 = smov 64   ;;  %v197_v46 = vlaneseq }
   0x4   :  { %359 = vmatprep.subr.bf16.mxu1 %v426_v1  ;;  %361 = vmatprep.mubr.msk.bf16.mxu1 %vm427_vm1, %v426_v1  ;;  %v29_v3 = vsel %vm27_vm0, %v26_v2, 0  ;;  %v83_v13 = vld [vmem:[%s526_s3] sm:$0xff]  ;;  %s431_s9 = smov 16   ;;  %s432_s10 = smov 48   ;;  %vm291_vm5 = vcmask 130048  }
   0x5   :  { %354 = vmatpush3.bf16.xpose.msra.mxu0 %v29_v3  ;;  %391 = vset.pattern.permute.xlu1 %v428_v5  ;;  %v129_v14 = vld [vmem:[%s524_s1] sm:$0xff]  ;;  %v84_v15 = vpack.c.bf16 %v83_v13, %v83_v13  ;;  %v198_v47 = vshrl.u32 %v197_v46, 7  ;;  %s433_s11 = smov 112   ;;  %s434_s12 = smov 96  }
   0x6   :  { %371 = vmatprep.subr.bf16.mxu0 %v426_v1  ;;  %390 = vset.pattern.permute.xlu0 %v428_v5  ;;  %v131_v16 = vpack.c.bf16 %v129_v14, %v129_v14  ;;  %v178_v17 = vld [vmem:[%s527_s4] sm:$0x1f]  ;;  %s435_s13 = smov 80   ;;  %s436_s14 = smov [#allocation2]  }
   0x7   :  { %190 = vperm.xlu1 %391, %v182_v4   ;;  %v196_v18 = vpack.c.bf16 %v178_v17, %v178_v17  ;;  %v87_v19 = vsel %vm85_vm2, %v84_v15, 0  ;;  %v179_v27 = vld [vmem:[%s525_s2] sm:$0xff]  ;;  %v199_v48 = vsub.s32 4, %v198_v47  ;;  %s430_s2 = smov 32   ;;  %s328_s15 = sshll.u32 %s436_s14, 4  ;;  %s329_s15 = int_to_ptr.vmem [resolvable:$true] %s328_s15 }
   0x8   :  { %360 = vmatpush3.bf16.msra.mxu1 %v87_v19  ;;  %v136_v21 = vsel %vm85_vm2, %v131_v16, 0  ;;  %s404_s16 = scalar_lea.vmem %s329_s15, 256  ;;  %p409_p1 = scmp.lt.s32.totalorder %s329_s15, %s329_s15 }
   0x9   :  { %v207_v20 = vsel %vm205_vm3, %v196_v18, 0  ;;  %365 = vmatprep.subr.bf16.mxu1 %v426_v1  ;;  %v200_v49 = vrot.slane %v178_v17, %v199_v48  ;;  %p405_p0 = scmp.ne.s32.totalorder %s329_s15, %s404_s16  ;;  %p410_p2 = scmp.lt.s32.totalorder %s404_s16, %s404_s16 }
   0xb   :  { %362 = vmatmul.mubr.msk.bf16.vlgmr.msra.gmra.mxu1 %vm27_vm0, %v26_v2  ;;  %p411_p3 = por %p410_p2, %p409_p1 }
   0xc   :  { %356 = vmatmul.mubr.msk.bf16.vlgmr.msra.gmra.mxu0 %vm27_vm0, %v26_v2  ;;  %366 = vmatpush3.bf16.msra.mxu1 %v136_v21 }
   0xd   :  { %373 = vmatprep.mubr.msk.bf16.mxu0 %vm427_vm1, %v426_v1  ;;  %372 = vmatpush3.bf16.msra.mxu0 %v207_v20  ;;  %p412_p4 = pnand %p411_p3, %p405_p0 }
   0xe   :  { %367 = vmatprep.mubr.msk.bf16.mxu1 %vm427_vm1, %v426_v1 }
  0x82   :  { %v191_v25 = vpop.permute.xlu1 %190 }
  0x83   :  { %v194_v28 = vmul.f32 %v191_v25, %v180_v26 }
  0xcb   :  { %v507_v34 = vpop.f32.mrf.mxu1 }
  0xcc   :  { %v65_v6 = vpop.f32.mrf.mxu0 }
  0xcd   :  { %v71_v7 = vmax.f32 %v65_v6, 0.0  ;;  %v363_v35 = vpop.f32.mrf.mxu1 }
  0xce   :  { %v357_v8 = vpop.f32.mrf.mxu0 }
  0xcf   :  { %v72_v9 = vsel %vm27_vm0, %v71_v7, -inf  ;;  %v126_v36 = vpop.f32.mrf.mxu1 }
  0xd0   :  { %73 = vmax.xlane.f32.xlu0 %v72_v9  ;;  %v68_v10 = vpop.f32.mrf.mxu0 }
  0xd1   :  { %v364_v37 = vpop.f32.mrf.mxu1 }
  0xd2   :  { %v358_v11 = vpop.f32.mrf.mxu0 }
  0xe6   :  { %185 = vperm.xlu0 %390, %v181_v12  }
 0x159   :  { %v74_v22 = vpop.xlane.xlu0 %73 }
 0x15a   :  { %v75_v23 = vsub.f32 %v71_v7, %v74_v22 }
 0x15c   :  { %v76_v24 = vmul.f32 1.442695, %v75_v23 }
 0x15e   :  { %392 = vpow2.f32 %v76_v24 }
 0x161   :  { %v186_v29 = vpop.permute.xlu0 %185 }
 0x162   :  { %v193_v30 = vmul.f32 %v186_v29, %v179_v27 }
 0x164   :  { %v195_v31 = vpack.c.bf16 %v194_v28, %v193_v30 }
 0x166   :  { %374 = vmatmul.mubr.msk.bf16.vlgmr.msra.gmra.mxu0 %vm201_vm4, %v195_v31 }
 0x16b   :  { %v393_v32 = vpop.eup %392 }
 0x16c   :  { %v78_v33 = vsel %vm27_vm0, %v393_v32, 0.0 }
 0x16d   :  { %79 = vadd.xlane.f32.xlu1 %v78_v33 }
 0x17e   :  { %294 = vrot.lane.b32.xlu1 %v507_v34, %s429_s8 }
 0x1f6   :  { %v80_v38 = vpop.xlane.xlu1 %79 }
 0x1f7   :  { %394 = vrcp.f32 %v80_v38 }
 0x1fa   :  { %v295_v1 = vpop.permute.xlu1 %294 }
 0x204   :  { %v395_v39 = vpop.eup %394 }
 0x205   :  { %v82_v40 = vmul.f32 %v395_v39, %v393_v32 }
 0x207   :  { %v130_v41 = vpack.c.bf16 %v82_v40, %v82_v40 }
 0x209   :  { %368 = vmatmul.mubr.msk.bf16.vlgmr.msra.gmra.mxu1 %vm27_vm0, %v130_v41 }
 0x226   :  { %v243_v42 = vpop.f32.mrf.mxu0 }
 0x227   :  { %v244_v50 = vadd.f32 %v243_v42, %v200_v49 }
 0x228   :  { %v375_v43 = vpop.f32.mrf.mxu0 }
 0x229   :  { %v343_v51 = vmul.f32 -1.442695, %v244_v50 }
 0x22a   :  { %v246_v44 = vpop.f32.mrf.mxu0 }
 0x22b   :  { %396 = vpow2.f32 %v343_v51  ;;  %v247_v52 = vadd.f32 %v246_v44, %v200_v49 }
 0x22c   :  { %v376_v45 = vpop.f32.mrf.mxu0 }
 0x22d   :  { %v344_v53 = vmul.f32 -1.442695, %v247_v52 }
 0x22f   :  { %398 = vpow2.f32 %v344_v53 }
 0x238   :  { %v397_v54 = vpop.eup %396 }
 0x239   :  { %v256_v55 = vadd.f32 1.0, %v397_v54 }
 0x23b   :  { %400 = vrcp.f32 %v256_v55 }
 0x23c   :  { %v399_v56 = vpop.eup %398 }
 0x23d   :  { %v257_v60 = vadd.f32 1.0, %v399_v56 }
 0x23f   :  { %402 = vrcp.f32 %v257_v60 }
 0x248   :  { %v401_v0 = vpop.eup %400 }
 0x249   :  { %v262_v2 = vmul.f32 %v401_v0, %v244_v50 }
 0x24c   :  { %v403_v4 = vpop.eup %402 }
 0x24d   :  { %v263_v5 = vmul.f32 %v403_v4, %v247_v52 }
 0x2c9   :  { %v172_v57 = vpop.f32.mrf.mxu1 }
 0x2ca   :  { %v173_v58 = vadd.f32 %v172_v57, %v129_v14 }
 0x2cb   :  { %v369_v59 = vpop.f32.mrf.mxu1 }
 0x2cc   :  { %v264_v61 = vmul.f32 %v173_v58, %v507_v34  ;;  %v297_v3 = vmul.f32 %v295_v1, %v173_v58 }
 0x2cd   :  { %v175_v62 = vpop.f32.mrf.mxu1 }
 0x2ce   :  { %274 = vrot.lane.b32.xlu1 %v264_v61, %s430_s2  ;;  %266 = vrot.lane.b32.xlu0 %v264_v61, %s429_s8  ;;  %v298_v18 = vadd.f32 %v297_v3, %v507_v34 }
 0x2cf   :  { %v370_v63 = vpop.f32.mrf.mxu1 }
 0x2d2   :  { %278 = vrot.lane.b32.xlu1 %v264_v61, %s431_s9  ;;  %270 = vrot.lane.b32.xlu0 %v264_v61, %s432_s10 }
 0x2d6   :  { %300 = vrot.lane.b32.xlu0 %v297_v3, %s433_s11  ;;  %283 = vrot.lane.b32.xlu1 %v262_v2, %s429_s8 }
 0x2da   :  { %304 = vrot.lane.b32.xlu0 %v297_v3, %s434_s12 }
 0x2de   :  { %308 = vrot.lane.b32.xlu0 %v297_v3, %s435_s13 }
 0x2e2   :  { %313 = vrot.lane.b32.xlu0 %v263_v5, %s429_s8 }
 0x340   :  { %v275_v6 = vpop.permute.xlu1 %274  ;;  %v267_v7 = vpop.permute.xlu0 %266 }
 0x341   :  { %v269_v8 = vadd.f32 %v267_v7, %v507_v34 }
 0x344   :  { %v279_v9 = vpop.permute.xlu1 %278  ;;  %v271_v10 = vpop.permute.xlu0 %270 }
 0x345   :  { %v273_v11 = vadd.f32 %v271_v10, %v269_v8 }
 0x347   :  { %v277_v12 = vadd.f32 %v275_v6, %v273_v11 }
 0x348   :  { %v301_v13 = vpop.permute.xlu0 %300  ;;  %v284_v15 = vpop.permute.xlu1 %283 }
 0x349   :  { %v281_v14 = vadd.f32 %v279_v9, %v277_v12  ;;  %v303_v19 = vadd.f32 %v301_v13, %v298_v18 }
 0x34b   :  { %v286_v16 = vadd.f32 %v284_v15, %v281_v14 }
 0x34c   :  { %v305_v17 = vpop.permute.xlu0 %304 }
 0x34d   :  { %288 = vrot.lane.b32.xlu1 %v286_v16, %s429_s8  ;;  %v307_v21 = vadd.f32 %v305_v17, %v303_v19 }
 0x350   :  { %v309_v20 = vpop.permute.xlu0 %308 }
 0x351   :  { %v311_v22 = vadd.f32 %v309_v20, %v307_v21 }
 0x354   :  { %v314_v23 = vpop.permute.xlu0 %313 }
 0x355   :  { %v316_v24 = vadd.f32 %v314_v23, %v311_v22 }
 0x357   :  { %318 = vrot.lane.b32.xlu0 %v316_v24, %s429_s8 }
 0x3bf   :  { %v289_v25 = vpop.permute.xlu1 %288 }
 0x3c0   :  { %292 = vst.msk [vmem:[#allocation2] sm:$0xff] %vm291_vm5, %v289_v25 }
 0x3c9   :  { %v319_v26 = vpop.permute.xlu0 %318 }
 0x3ca   :  { %322 = vst.msk [vmem:[#allocation2 + $0x8] sm:$0xff] %vm291_vm5, %v319_v26 }
 0x3cb   :  { %415 = shalt.err (!%p412_p4)
}
 0x3cc   :  { %s437_s17 = smov 128   ;;  %s438_s18 = smov 8  }
 0x3cd   :  { %334 = dma.vmem_to_hbm [thread:$0]  %s329_s15, 256, %s529_s6, [#allocation3], %s437_s17, %s437_s17, %s438_s18  }
 0x3ce   :  { %424 = dma.done.wait [#allocation3], 256  }
 0x3cf   :  { %425 = vsyncadd [#allocation3], 4294967040 }
 0x3d0   :  { %338 = vsyncpa [#allocation3], 1 }

</bundles_post_ra>
